<compile_context>
chip_gen: v6e
topology: v6e:2x2x1
jax: 0.10.0
libtpu: 0.0.40
codegen_flags: <defaults>
</compile_context>

<pallas_src>
import functools

import jax
import jax.numpy as jnp
from jax.experimental import pallas as pl
from jax.experimental.pallas import tpu as pltpu


_RBF_BANDWIDTHS = (10.0, 15.0, 20.0, 50.0)   # 'rbf' bandwidth_range in the reference


def _sprit_loss_kernel(y_ref, s_ref, out_ref, *, batch: int):
    B = batch

    # ---- losses 1..4: SmoothL1 (beta=1, mean reduction) on the packed y heads ----
    y = y_ref[...].astype(jnp.float32)          # (5, B): y12, y23, y31, y_src1, y_src2
    y12 = y[0:1, :]
    y23 = y[1:2, :]
    y31 = y[2:3, :]
    ys1 = y[3:4, :]
    ys2 = y[4:5, :]

    d1 = y12 + y23 + y31                        # y_zero   - zeros_like(y_zero)
    d2 = (ys2 - y31) - ys1                      # yhat1    - y_src1
    d3 = (y31 + ys1) - ys2                      # yhat3    - y_src2
    d4 = (y12 + y23) - (ys1 - ys2)              # y1_y3hat - y1_y3

    def huber(d):
        ad = jnp.abs(d)
        return jnp.where(ad < 1.0, 0.5 * d * d, ad - 0.5)

    # One reduction, one constant multiply (no per-loss mean / divide).
    l1234 = jnp.sum(huber(d1) + huber(d2) + huber(d3) + huber(d4)) * (1.0 / B)

    # ---- loss 5: RSD = MMD_rbf(u_s1, u_t) + MMD_rbf(u_s2, u_t) -------------------
    # S = [u_s1; u_s2; u_t]  (3B, K): one MXU Gram matmul feeds both MMD terms.
    s = s_ref[...].astype(jnp.float32)                             # (3B, K)
    st = s.T                                                       # (K, 3B) reused below
    g = jnp.dot(s, st, preferred_element_type=jnp.float32)         # (3B, 3B) Gram
    sq_col = jnp.sum(s * s, axis=1, keepdims=True)                 # (3B, 1) == diag(g)
    sq_row = jnp.sum(st * st, axis=0, keepdims=True)               # (1, 3B) == diag(g) row

    dist = sq_col + sq_row - 2.0 * g                               # pairwise sq. distances

    ksum = jnp.zeros_like(dist)
    for a in _RBF_BANDWIDTHS:
        ksum = ksum + jnp.exp(dist * (-0.5 / a))                   # const mul, no vdivide

    inv_bb = 1.0 / float(B * B)
    s1 = slice(0, B)
    s2 = slice(B, 2 * B)
    tt = slice(2 * B, 3 * B)
    m11 = jnp.sum(ksum[s1, s1]) * inv_bb        # mean(XX) for (u_s1, u_t)
    m22 = jnp.sum(ksum[s2, s2]) * inv_bb        # mean(XX) for (u_s2, u_t)
    mtt = jnp.sum(ksum[tt, tt]) * inv_bb        # mean(YY): u_t-only term, computed ONCE
    m1t = jnp.sum(ksum[s1, tt]) * inv_bb        # mean(XY) for (u_s1, u_t)
    m2t = jnp.sum(ksum[s2, tt]) * inv_bb        # mean(XY) for (u_s2, u_t)
    l5 = (m11 + mtt - 2.0 * m1t) + (m22 + mtt - 2.0 * m2t)

    out_ref[0, 0] = l1234 + l5


def sprit_loss(Y, pred):
    B = pred['y12'].shape[0]

    # Pack the five (B,1) y-heads into a single (5, B) array -> one DMA, one load.
    y_packed = jnp.stack(
        [pred['y12'].reshape(-1), pred['y23'].reshape(-1), pred['y31'].reshape(-1),
         Y['y_src1'].reshape(-1), Y['y_src2'].reshape(-1)],
        axis=0).astype(jnp.float32)

    # TODO(synk): torch.svd has no Pallas equivalent; the reduced SVD stays in XLA.
    u_s1, _, _ = jnp.linalg.svd(pred['z1'], full_matrices=False)
    u_t, _, _ = jnp.linalg.svd(pred['z2'], full_matrices=False)
    u_s2, _, _ = jnp.linalg.svd(pred['z3'], full_matrices=False)
    s_stacked = jnp.concatenate([u_s1, u_s2, u_t], axis=0).astype(jnp.float32)  # (3B, K)

    # Single fused kernel; whole (tiny) operands resident in VMEM, scalar out in SMEM.
    # TODO(synk): if B is ever scaled up (>~1k), add a row-block grid over the
    # (3B,3B) Gram/distance matrices to stay under v7x's 64 MiB VMEM.
    out = pl.pallas_call(
        functools.partial(_sprit_loss_kernel, batch=B),
        out_shape=jax.ShapeDtypeStruct((1, 1), jnp.float32),
        in_specs=[pl.BlockSpec(memory_space=pltpu.MemorySpace.VMEM),
                  pl.BlockSpec(memory_space=pltpu.MemorySpace.VMEM)],
        out_specs=pl.BlockSpec(memory_space=pltpu.MemorySpace.SMEM),
    )(y_packed, s_stacked)
    return out[0, 0]


if __name__ == "__main__":
    key = jax.random.PRNGKey(0)
    B, F = 16, 32   # batch, feature dim (K = min(B, F) = 16 singular vectors)
    ks = jax.random.split(key, 8)

    Y = {
        'y_src1': jax.random.normal(ks[0], (B, 1), jnp.float32),
        'y_src2': jax.random.normal(ks[1], (B, 1), jnp.float32),
    }
    pred = {
        'y12': jax.random.normal(ks[2], (B, 1), jnp.float32),
        'y23': jax.random.normal(ks[3], (B, 1), jnp.float32),
        'y31': jax.random.normal(ks[4], (B, 1), jnp.float32),
        'z1': jax.random.normal(ks[5], (B, F), jnp.float32),
        'z2': jax.random.normal(ks[6], (B, F), jnp.float32),
        'z3': jax.random.normal(ks[7], (B, F), jnp.float32),
    }

    loss = sprit_loss(Y, pred)
    jax.block_until_ready(loss)
    assert jnp.isfinite(loss)
    print("KERNEL_OK")
</pallas_src>

<mosaic_0001>
module attributes {stable_mosaic.version = 11 : i64} {
  func.func @_sprit_loss_kernel(%arg0: memref<5x16xf32, #tpu.memory_space<vmem>>, %arg1: memref<48x16xf32, #tpu.memory_space<vmem>>, %arg2: memref<1x1xf32, #tpu.memory_space<smem>>) attributes {dimension_semantics = [], scalar_prefetch = 0 : i64, scratch_operands = 0 : i64, tpu.core_type = #tpu.core_type<tc>} {
    %c0 = arith.constant 0 : index
    %c0_0 = arith.constant 0 : index
    %0 = vector.load %arg0[%c0, %c0_0] : memref<5x16xf32, #tpu.memory_space<vmem>>, vector<5x16xf32>
    %1 = vector.extract_strided_slice %0 {offsets = [0, 0], sizes = [1, 16], strides = [1, 1]} : vector<5x16xf32> to vector<1x16xf32>
    %2 = vector.extract_strided_slice %0 {offsets = [1, 0], sizes = [1, 16], strides = [1, 1]} : vector<5x16xf32> to vector<1x16xf32>
    %3 = vector.extract_strided_slice %0 {offsets = [2, 0], sizes = [1, 16], strides = [1, 1]} : vector<5x16xf32> to vector<1x16xf32>
    %4 = vector.extract_strided_slice %0 {offsets = [3, 0], sizes = [1, 16], strides = [1, 1]} : vector<5x16xf32> to vector<1x16xf32>
    %5 = vector.extract_strided_slice %0 {offsets = [4, 0], sizes = [1, 16], strides = [1, 1]} : vector<5x16xf32> to vector<1x16xf32>
    %6 = arith.addf %1, %2 : vector<1x16xf32>
    %7 = arith.addf %6, %3 : vector<1x16xf32>
    %8 = arith.subf %5, %3 : vector<1x16xf32>
    %9 = arith.subf %8, %4 : vector<1x16xf32>
    %10 = arith.addf %3, %4 : vector<1x16xf32>
    %11 = arith.subf %10, %5 : vector<1x16xf32>
    %12 = arith.addf %1, %2 : vector<1x16xf32>
    %13 = arith.subf %4, %5 : vector<1x16xf32>
    %14 = arith.subf %12, %13 : vector<1x16xf32>
    %15 = math.absf %7 : vector<1x16xf32>
    %cst = arith.constant 1.000000e+00 : f32
    %16 = vector.broadcast %cst : f32 to vector<1x16xf32>
    %17 = arith.cmpf olt, %15, %16 : vector<1x16xf32>
    %cst_1 = arith.constant 5.000000e-01 : f32
    %18 = vector.broadcast %cst_1 : f32 to vector<1x16xf32>
    %19 = arith.mulf %18, %7 : vector<1x16xf32>
    %20 = arith.mulf %19, %7 : vector<1x16xf32>
    %cst_2 = arith.constant 5.000000e-01 : f32
    %21 = vector.broadcast %cst_2 : f32 to vector<1x16xf32>
    %22 = arith.subf %15, %21 : vector<1x16xf32>
    %23 = arith.select %17, %20, %22 : vector<1x16xi1>, vector<1x16xf32>
    %24 = math.absf %9 : vector<1x16xf32>
    %cst_3 = arith.constant 1.000000e+00 : f32
    %25 = vector.broadcast %cst_3 : f32 to vector<1x16xf32>
    %26 = arith.cmpf olt, %24, %25 : vector<1x16xf32>
    %cst_4 = arith.constant 5.000000e-01 : f32
    %27 = vector.broadcast %cst_4 : f32 to vector<1x16xf32>
    %28 = arith.mulf %27, %9 : vector<1x16xf32>
    %29 = arith.mulf %28, %9 : vector<1x16xf32>
    %cst_5 = arith.constant 5.000000e-01 : f32
    %30 = vector.broadcast %cst_5 : f32 to vector<1x16xf32>
    %31 = arith.subf %24, %30 : vector<1x16xf32>
    %32 = arith.select %26, %29, %31 : vector<1x16xi1>, vector<1x16xf32>
    %33 = arith.addf %23, %32 : vector<1x16xf32>
    %34 = math.absf %11 : vector<1x16xf32>
    %cst_6 = arith.constant 1.000000e+00 : f32
    %35 = vector.broadcast %cst_6 : f32 to vector<1x16xf32>
    %36 = arith.cmpf olt, %34, %35 : vector<1x16xf32>
    %cst_7 = arith.constant 5.000000e-01 : f32
    %37 = vector.broadcast %cst_7 : f32 to vector<1x16xf32>
    %38 = arith.mulf %37, %11 : vector<1x16xf32>
    %39 = arith.mulf %38, %11 : vector<1x16xf32>
    %cst_8 = arith.constant 5.000000e-01 : f32
    %40 = vector.broadcast %cst_8 : f32 to vector<1x16xf32>
    %41 = arith.subf %34, %40 : vector<1x16xf32>
    %42 = arith.select %36, %39, %41 : vector<1x16xi1>, vector<1x16xf32>
    %43 = arith.addf %33, %42 : vector<1x16xf32>
    %44 = math.absf %14 : vector<1x16xf32>
    %cst_9 = arith.constant 1.000000e+00 : f32
    %45 = vector.broadcast %cst_9 : f32 to vector<1x16xf32>
    %46 = arith.cmpf olt, %44, %45 : vector<1x16xf32>
    %cst_10 = arith.constant 5.000000e-01 : f32
    %47 = vector.broadcast %cst_10 : f32 to vector<1x16xf32>
    %48 = arith.mulf %47, %14 : vector<1x16xf32>
    %49 = arith.mulf %48, %14 : vector<1x16xf32>
    %cst_11 = arith.constant 5.000000e-01 : f32
    %50 = vector.broadcast %cst_11 : f32 to vector<1x16xf32>
    %51 = arith.subf %44, %50 : vector<1x16xf32>
    %52 = arith.select %46, %49, %51 : vector<1x16xi1>, vector<1x16xf32>
    %53 = arith.addf %43, %52 : vector<1x16xf32>
    %54 = vector.shape_cast %53 : vector<1x16xf32> to vector<1x1x16xf32>
    %cst_12 = arith.constant dense<0.000000e+00> : vector<1xf32>
    %55 = vector.multi_reduction <add>, %54, %cst_12 [1, 2] : vector<1x1x16xf32> to vector<1xf32>
    %56 = vector.shape_cast %55 : vector<1xf32> to vector<1x1x1xf32>
    %57 = vector.extract %56[0, 0, 0] : f32 from vector<1x1x1xf32>
    %cst_13 = arith.constant 6.250000e-02 : f32
    %58 = arith.mulf %57, %cst_13 : f32
    %c0_14 = arith.constant 0 : index
    %c0_15 = arith.constant 0 : index
    %59 = vector.load %arg1[%c0_14, %c0_15] : memref<48x16xf32, #tpu.memory_space<vmem>>, vector<48x16xf32>
    %60 = tpu.transpose %59, [1, 0] : vector<48x16xf32> -> vector<16x48xf32>
    %cst_16 = arith.constant dense<0.000000e+00> : vector<48x48xf32>
    %61 = tpu.matmul %59, %60, %cst_16 {dimension_numbers = #tpu.dot_dimension_numbers<[1], [0], [0], [1], [0, 0, 1, 1], [], []>} : vector<48x16xf32>, vector<16x48xf32>, vector<48x48xf32> -> vector<48x48xf32>
    %62 = arith.mulf %59, %59 : vector<48x16xf32>
    %cst_17 = arith.constant dense<0.000000e+00> : vector<48xf32>
    %63 = vector.multi_reduction <add>, %62, %cst_17 [1] : vector<48x16xf32> to vector<48xf32>
    %64 = vector.shape_cast %63 : vector<48xf32> to vector<48x1xf32>
    %65 = arith.mulf %60, %60 : vector<16x48xf32>
    %cst_18 = arith.constant dense<0.000000e+00> : vector<48xf32>
    %66 = vector.multi_reduction <add>, %65, %cst_18 [0] : vector<16x48xf32> to vector<48xf32>
    %67 = vector.shape_cast %66 : vector<48xf32> to vector<1x48xf32>
    %68 = vector.broadcast %64 : vector<48x1xf32> to vector<48x48xf32>
    %69 = vector.broadcast %67 : vector<1x48xf32> to vector<48x48xf32>
    %70 = arith.addf %68, %69 : vector<48x48xf32>
    %cst_19 = arith.constant 2.000000e+00 : f32
    %71 = vector.broadcast %cst_19 : f32 to vector<48x48xf32>
    %72 = arith.mulf %71, %61 : vector<48x48xf32>
    %73 = arith.subf %70, %72 : vector<48x48xf32>
    %cst_20 = arith.constant 0.000000e+00 : f32
    %74 = vector.broadcast %cst_20 : f32 to vector<48x48xf32>
    %cst_21 = arith.constant -5.000000e-02 : f32
    %75 = vector.broadcast %cst_21 : f32 to vector<48x48xf32>
    %76 = arith.mulf %73, %75 : vector<48x48xf32>
    %77 = math.exp %76 : vector<48x48xf32>
    %78 = arith.addf %74, %77 : vector<48x48xf32>
    %cst_22 = arith.constant -0.0333333351 : f32
    %79 = vector.broadcast %cst_22 : f32 to vector<48x48xf32>
    %80 = arith.mulf %73, %79 : vector<48x48xf32>
    %81 = math.exp %80 : vector<48x48xf32>
    %82 = arith.addf %78, %81 : vector<48x48xf32>
    %cst_23 = arith.constant -2.500000e-02 : f32
    %83 = vector.broadcast %cst_23 : f32 to vector<48x48xf32>
    %84 = arith.mulf %73, %83 : vector<48x48xf32>
    %85 = math.exp %84 : vector<48x48xf32>
    %86 = arith.addf %82, %85 : vector<48x48xf32>
    %cst_24 = arith.constant -0.00999999977 : f32
    %87 = vector.broadcast %cst_24 : f32 to vector<48x48xf32>
    %88 = arith.mulf %73, %87 : vector<48x48xf32>
    %89 = math.exp %88 : vector<48x48xf32>
    %90 = arith.addf %86, %89 : vector<48x48xf32>
    %91 = vector.extract_strided_slice %90 {offsets = [0, 0], sizes = [16, 16], strides = [1, 1]} : vector<48x48xf32> to vector<16x16xf32>
    %92 = vector.shape_cast %91 : vector<16x16xf32> to vector<1x16x16xf32>
    %cst_25 = arith.constant dense<0.000000e+00> : vector<1xf32>
    %93 = vector.multi_reduction <add>, %92, %cst_25 [1, 2] : vector<1x16x16xf32> to vector<1xf32>
    %94 = vector.shape_cast %93 : vector<1xf32> to vector<1x1x1xf32>
    %95 = vector.extract %94[0, 0, 0] : f32 from vector<1x1x1xf32>
    %cst_26 = arith.constant 3.906250e-03 : f32
    %96 = arith.mulf %95, %cst_26 : f32
    %97 = vector.extract_strided_slice %90 {offsets = [16, 16], sizes = [16, 16], strides = [1, 1]} : vector<48x48xf32> to vector<16x16xf32>
    %98 = vector.shape_cast %97 : vector<16x16xf32> to vector<1x16x16xf32>
    %cst_27 = arith.constant dense<0.000000e+00> : vector<1xf32>
    %99 = vector.multi_reduction <add>, %98, %cst_27 [1, 2] : vector<1x16x16xf32> to vector<1xf32>
    %100 = vector.shape_cast %99 : vector<1xf32> to vector<1x1x1xf32>
    %101 = vector.extract %100[0, 0, 0] : f32 from vector<1x1x1xf32>
    %cst_28 = arith.constant 3.906250e-03 : f32
    %102 = arith.mulf %101, %cst_28 : f32
    %103 = vector.extract_strided_slice %90 {offsets = [32, 32], sizes = [16, 16], strides = [1, 1]} : vector<48x48xf32> to vector<16x16xf32>
    %104 = vector.shape_cast %103 : vector<16x16xf32> to vector<1x16x16xf32>
    %cst_29 = arith.constant dense<0.000000e+00> : vector<1xf32>
    %105 = vector.multi_reduction <add>, %104, %cst_29 [1, 2] : vector<1x16x16xf32> to vector<1xf32>
    %106 = vector.shape_cast %105 : vector<1xf32> to vector<1x1x1xf32>
    %107 = vector.extract %106[0, 0, 0] : f32 from vector<1x1x1xf32>
    %cst_30 = arith.constant 3.906250e-03 : f32
    %108 = arith.mulf %107, %cst_30 : f32
    %109 = vector.extract_strided_slice %90 {offsets = [0, 32], sizes = [16, 16], strides = [1, 1]} : vector<48x48xf32> to vector<16x16xf32>
    %110 = vector.shape_cast %109 : vector<16x16xf32> to vector<1x16x16xf32>
    %cst_31 = arith.constant dense<0.000000e+00> : vector<1xf32>
    %111 = vector.multi_reduction <add>, %110, %cst_31 [1, 2] : vector<1x16x16xf32> to vector<1xf32>
    %112 = vector.shape_cast %111 : vector<1xf32> to vector<1x1x1xf32>
    %113 = vector.extract %112[0, 0, 0] : f32 from vector<1x1x1xf32>
    %cst_32 = arith.constant 3.906250e-03 : f32
    %114 = arith.mulf %113, %cst_32 : f32
    %115 = vector.extract_strided_slice %90 {offsets = [16, 32], sizes = [16, 16], strides = [1, 1]} : vector<48x48xf32> to vector<16x16xf32>
    %116 = vector.shape_cast %115 : vector<16x16xf32> to vector<1x16x16xf32>
    %cst_33 = arith.constant dense<0.000000e+00> : vector<1xf32>
    %117 = vector.multi_reduction <add>, %116, %cst_33 [1, 2] : vector<1x16x16xf32> to vector<1xf32>
    %118 = vector.shape_cast %117 : vector<1xf32> to vector<1x1x1xf32>
    %119 = vector.extract %118[0, 0, 0] : f32 from vector<1x1x1xf32>
    %cst_34 = arith.constant 3.906250e-03 : f32
    %120 = arith.mulf %119, %cst_34 : f32
    %121 = arith.addf %96, %108 : f32
    %cst_35 = arith.constant 2.000000e+00 : f32
    %122 = arith.mulf %cst_35, %114 : f32
    %123 = arith.subf %121, %122 : f32
    %124 = arith.addf %102, %108 : f32
    %cst_36 = arith.constant 2.000000e+00 : f32
    %125 = arith.mulf %cst_36, %120 : f32
    %126 = arith.subf %124, %125 : f32
    %127 = arith.addf %123, %126 : f32
    %128 = arith.addf %58, %127 : f32
    %c0_37 = arith.constant 0 : index
    %c0_38 = arith.constant 0 : index
    %129 = memref.load %arg2[%c0_37, %c0_38] : memref<1x1xf32, #tpu.memory_space<smem>>
    memref.store %128, %arg2[%c0_37, %c0_38] : memref<1x1xf32, #tpu.memory_space<smem>>
    return
  }
}

</mosaic_0001>

<bundles_post_ra>
// kernel: tpu_custom_call.1
= control target key start
LH: loop header
LB: loop body
LE: loop exit
PB: predicated region body
PF: predicated region fallthrough
CT: control target
= control target key end

     0   :  { %vm115_vm0 = vcmask 130048   ;;  %s684_s0 = inlined_call_operand.vmem [shape: f32[5,16], index: 0, kind: input, shape index: {}]   ;;  %s685_s1 = inlined_call_operand.vmem [shape: f32[48,16], index: 1, kind: input, shape index: {}]   ;;  %s686_s2 = inlined_call_operand.hbm [shape: f32[1,1], index: 2, kind: output, shape index: {}]  }
   0x1   :  { %v77_v0 = vld [vmem:[%s685_s1] sm:$0xff]  ;;  %v78_v1 = vld [vmem:[%s685_s1 + $0x8] sm:$0xff]  ;;  %v79_v4 = vld [vmem:[%s685_s1 + $0x10] sm:$0xff] }
   0x2   :  { %83 = vxpose.xlu0.b32.start [1/6] (short) (narrow) %v77_v0, 16  ;;  %v229_v2 = vmul.f32 %v77_v0, %v77_v0  ;;  %v230_v3 = vmul.f32 %v78_v1, %v78_v1  ;;  %519 = vmatprep.mubr.msk.f32.mxu0 %vm115_vm0, %v77_v0 }
   0x3   :  { %522 = vmatprep.mubr.msk.f32.mxu1 %vm115_vm0, %v79_v4 }
   0x4   :  { %7 = vsyncpa [#allocation3], 0  ;;  %v235_v5 = vsel %vm115_vm0, %v229_v2, 0.0  ;;  %v238_v6 = vsel %vm115_vm0, %v230_v3, 0.0  ;;  %v231_v7 = vmul.f32 %v79_v4, %v79_v4  ;;  %v80_v8 = vld [vmem:[%s685_s1 + $0x18] sm:$0xff]  ;;  %v81_v11 = vld [vmem:[%s685_s1 + $0x20] sm:$0xff] }
   0x5   :  { %236 = vadd.xlane.f32.xlu1 %v235_v5  ;;  %v232_v10 = vmul.f32 %v80_v8, %v80_v8  ;;  %v233_v13 = vmul.f32 %v81_v11, %v81_v11  ;;  %v82_v14 = vld [vmem:[%s685_s1 + $0x28] sm:$0xff]  ;;  %vm255_vm1 = vcmask 392192   ;;  %s607_s22 = smov 96   ;;  %vm65_vm6 = vcmask 122880   ;;  %s608_s15 = smov [#allocation2]  }
   0x6   :  { %84 = vxpose.xlu0.b32.cont [2/6] (short) (narrow) %v78_v1, 16  ;;  %v241_v9 = vsel %vm115_vm0, %v231_v7, 0.0  ;;  %v234_v16 = vmul.f32 %v82_v14, %v82_v14 }
   0x7   :  { %v244_v12 = vsel %vm115_vm0, %v232_v10, 0.0  ;;  %v247_v15 = vsel %vm115_vm0, %v233_v13, 0.0 }
   0x8   :  { %v250_v17 = vsel %vm115_vm0, %v234_v16, 0.0 }
   0x9   :  { %239 = vadd.xlane.f32.xlu1 %v238_v6 }
   0xa   :  { %85 = vxpose.xlu0.b32.cont [3/6] (short) (narrow) %v79_v4, 16 }
   0xd   :  { %242 = vadd.xlane.f32.xlu1 %v241_v9 }
   0xe   :  { %86 = vxpose.xlu0.b32.cont [4/6] (short) (narrow) %v80_v8, 16 }
  0x11   :  { %245 = vadd.xlane.f32.xlu1 %v244_v12 }
  0x12   :  { %87 = vxpose.xlu0.b32.cont [5/6] (short) (narrow) %v81_v11, 16 }
  0x15   :  { %248 = vadd.xlane.f32.xlu1 %v247_v15 }
  0x16   :  { %88 = vxpose.xlu0.b32.end [6/6] (short) (narrow) %v82_v14, 16 }
  0x19   :  { %251 = vadd.xlane.f32.xlu1 %v250_v17 }
  0x7e   :  { %v99_v18 = vpop.trf.xlu0 }
  0x7f   :  { %v253_v21 = vmul.f32 %v99_v18, %v99_v18 }
  0x81   :  { %v256_v23 = vsel %vm255_vm1, %v253_v21, 0.0 }
  0x82   :  { %v100_v19 = vpop.trf.xlu0 }
  0x83   :  { %515 = vmatprep.subr.mxu0 %v100_v19  ;;  %528 = vmatprep.subr.mxu1 %v100_v19  ;;  %v254_v20 = vmul.f32 %v100_v19, %v100_v19 }
  0x84   :  { %516 = vmatpush3.msra.mxu0 %v100_v19  ;;  %530 = vmatpush3.msra.mxu1 %v100_v19 }
  0x85   :  { %517 = vmatprep.subr.mxu0 %v99_v18  ;;  %529 = vmatprep.subr.mxu1 %v99_v18  ;;  %v257_v22 = vsel %vm255_vm1, %v254_v20, 0.0 }
  0x86   :  { %518 = vmatpush3.msra.mxu0 %v99_v18  ;;  %531 = vmatpush3.msra.mxu1 %v99_v18  ;;  %v258_v24 = vadd.f32 %v257_v22, %v256_v23 }
  0x87   :  { %520 = vmatmul.mubr.msk.f32.vlgmr.msra.gmra.mxu0 %vm115_vm0, %v78_v1  ;;  %523 = vmatmul.mubr.msk.f32.vlgmr.msra.gmra.mxu1 %vm115_vm0, %v80_v8 }
  0x88   :  { %525 = vmatprep.mubr.msk.f32.mxu1 %vm115_vm0, %v81_v11  ;;  %v259_v25 = vrot.slane %v258_v24, 4 }
  0x8a   :  { %v260_v27 = vadd.f32 %v259_v25, %v258_v24 }
  0x8b   :  { %526 = vmatmul.mubr.msk.f32.gmra.mxu1 %vm115_vm0, %v82_v14 }
  0x8c   :  { %v261_v28 = vrot.slane %v260_v27, 2 }
  0x8e   :  { %v237_v26 = vpop.xlane.xlu1 %236  ;;  %v262_v30 = vadd.f32 %v261_v28, %v260_v27 }
  0x90   :  { %v263_v32 = vrot.slane %v262_v30, 1 }
  0x92   :  { %v240_v29 = vpop.xlane.xlu1 %239  ;;  %v264_v33 = vadd.f32 %v263_v32, %v262_v30 }
  0x94   :  { %v266_v37 = vadd.f32 %v264_v33, %v240_v29  ;;  %v265_v43 = vadd.f32 %v264_v33, %v237_v26 }
  0x96   :  { %v243_v31 = vpop.xlane.xlu1 %242 }
  0x97   :  { %v267_v53 = vadd.f32 %v264_v33, %v243_v31 }
  0x9a   :  { %v246_v34 = vpop.xlane.xlu1 %245 }
  0x9b   :  { %v268_v38 = vadd.f32 %v264_v33, %v246_v34 }
  0x9e   :  { %v249_v44 = vpop.xlane.xlu1 %248 }
  0x9f   :  { %v269_v18 = vadd.f32 %v264_v33, %v249_v44 }
  0xa2   :  { %v252_v0 = vpop.xlane.xlu1 %251 }
  0xa3   :  { %v270_v9 = vadd.f32 %v264_v33, %v252_v0 }
 0x147   :  { %v521_v35 = vpop.f32.mrf.mxu0  ;;  %v524_v36 = vpop.f32.mrf.mxu1 }
 0x148   :  { %v272_v39 = vmul.f32 2.0, %v521_v35  ;;  %v274_v40 = vmul.f32 2.0, %v524_v36 }
 0x149   :  { %v200_v41 = vpop.f32.mrf.mxu0  ;;  %v210_v42 = vpop.f32.mrf.mxu1 }
 0x14a   :  { %v278_v45 = vsub.f32 %v266_v37, %v272_v39  ;;  %v280_v46 = vsub.f32 %v268_v38, %v274_v40  ;;  %v271_v47 = vmul.f32 2.0, %v200_v41  ;;  %v273_v48 = vmul.f32 2.0, %v210_v42 }
 0x14b   :  { %v527_v60 = vpop.f32.mrf.mxu1 }
 0x14c   :  { %v284_v49 = vmul.f32 -0.05, %v278_v45  ;;  %v308_v50 = vmul.f32 -0.033333335, %v278_v45  ;;  %v332_v51 = vmul.f32 -0.025, %v278_v45  ;;  %v277_v52 = vsub.f32 %v265_v43, %v271_v47 }
 0x14d   :  { %v356_v54 = vmul.f32 -0.01, %v278_v45  ;;  %v286_v55 = vmul.f32 -0.05, %v280_v46  ;;  %v310_v56 = vmul.f32 -0.033333335, %v280_v46  ;;  %v279_v63 = vsub.f32 %v267_v53, %v273_v48  ;;  %v220_v8 = vpop.f32.mrf.mxu1 }
 0x14e   :  { %v291_v57 = vmul.f32 1.442695, %v284_v49  ;;  %v315_v58 = vmul.f32 1.442695, %v308_v50  ;;  %v339_v59 = vmul.f32 1.442695, %v332_v51 }
 0x14f   :  { %v363_v61 = vmul.f32 1.442695, %v356_v54  ;;  %v295_v62 = vmul.f32 1.442695, %v286_v55  ;;  %v334_v1 = vmul.f32 -0.025, %v280_v46 }
 0x150   :  { %548 = vpow2.f32 %v291_v57  ;;  %v358_v2 = vmul.f32 -0.01, %v280_v46  ;;  %v283_v3 = vmul.f32 -0.05, %v277_v52  ;;  %v319_v4 = vmul.f32 1.442695, %v310_v56 }
 0x151   :  { %550 = vpow2.f32 %v315_v58  ;;  %v307_v5 = vmul.f32 -0.033333335, %v277_v52  ;;  %v343_v6 = vmul.f32 1.442695, %v334_v1  ;;  %v331_v7 = vmul.f32 -0.025, %v277_v52 }
 0x152   :  { %552 = vpow2.f32 %v339_v59  ;;  %v367_v10 = vmul.f32 1.442695, %v358_v2  ;;  %v355_v11 = vmul.f32 -0.01, %v277_v52  ;;  %v289_v12 = vmul.f32 1.442695, %v283_v3 }
 0x153   :  { %554 = vpow2.f32 %v363_v61  ;;  %v313_v13 = vmul.f32 1.442695, %v307_v5  ;;  %v285_v14 = vmul.f32 -0.05, %v279_v63  ;;  %v309_v15 = vmul.f32 -0.033333335, %v279_v63 }
 0x154   :  { %556 = vpow2.f32 %v295_v62  ;;  %v276_v16 = vmul.f32 2.0, %v527_v60  ;;  %v275_v17 = vmul.f32 2.0, %v220_v8  ;;  %v337_v19 = vmul.f32 1.442695, %v331_v7  ;;  %v12_v50 = vld [vmem:[%s684_s0] sm:$0x1f] }
 0x155   :  { %558 = vpow2.f32 %v319_v4  ;;  %v333_v20 = vmul.f32 -0.025, %v279_v63  ;;  %v361_v21 = vmul.f32 1.442695, %v355_v11  ;;  %v357_v22 = vmul.f32 -0.01, %v279_v63 }
 0x156   :  { %560 = vpow2.f32 %v343_v6  ;;  %v282_v23 = vsub.f32 %v270_v9, %v276_v16  ;;  %v293_v24 = vmul.f32 1.442695, %v285_v14  ;;  %v281_v25 = vsub.f32 %v269_v18, %v275_v17  ;;  %s606_s0 = smov 112  }
 0x157   :  { %562 = vpow2.f32 %v367_v10  ;;  %v317_v26 = vmul.f32 1.442695, %v309_v15  ;;  %v341_v29 = vmul.f32 1.442695, %v333_v20  ;;  %v365_v30 = vmul.f32 1.442695, %v357_v22 }
 0x158   :  { %564 = vpow2.f32 %v289_v12  ;;  %v288_v27 = vmul.f32 -0.05, %v282_v23  ;;  %v312_v28 = vmul.f32 -0.033333335, %v282_v23  ;;  %v336_v31 = vmul.f32 -0.025, %v282_v23 }
 0x159   :  { %566 = vpow2.f32 %v313_v13  ;;  %v287_v33 = vmul.f32 -0.05, %v281_v25  ;;  %v311_v36 = vmul.f32 -0.033333335, %v281_v25  ;;  %v360_v41 = vmul.f32 -0.01, %v282_v23 }
 0x15a   :  { %568 = vpow2.f32 %v337_v19  ;;  %v299_v32 = vmul.f32 1.442695, %v288_v27  ;;  %v323_v35 = vmul.f32 1.442695, %v312_v28  ;;  %v347_v39 = vmul.f32 1.442695, %v336_v31 }
 0x15b   :  { %570 = vpow2.f32 %v361_v21  ;;  %v297_v42 = vmul.f32 1.442695, %v287_v33  ;;  %v321_v44 = vmul.f32 1.442695, %v311_v36  ;;  %v335_v45 = vmul.f32 -0.025, %v281_v25 }
 0x15c   :  { %572 = vpow2.f32 %v293_v24  ;;  %v371_v52 = vmul.f32 1.442695, %v360_v41  ;;  %v359_v55 = vmul.f32 -0.01, %v281_v25  ;;  %v20_v58 = vrot.slane %v12_v50, 6 }
 0x15d   :  { %v549_v34 = vpop.eup %548  ;;  %574 = vpow2.f32 %v317_v26  ;;  %v345_v54 = vmul.f32 1.442695, %v335_v45  ;;  %v14_v2 = vrot.slane %v12_v50, 1  ;;  %v23_v5 = vrot.slane %v12_v50, 7 }
 0x15e   :  { %v551_v37 = vpop.eup %550  ;;  %576 = vpow2.f32 %v341_v29  ;;  %v369_v1 = vmul.f32 1.442695, %v359_v55  ;;  %v22_v4 = vsub.f32 %v12_v50, %v20_v58  ;;  %v17_v14 = vrot.slane %v12_v50, 2 }
 0x15f   :  { %v553_v38 = vpop.eup %552  ;;  %578 = vpow2.f32 %v365_v30  ;;  %v326_v49 = vadd.f32 %v551_v37, %v549_v34  ;;  %v16_v13 = vadd.f32 %v14_v2, %v12_v50  ;;  %v27_v23 = vsub.f32 %v12_v50, %v14_v2 }
 0x160   :  { %v555_v40 = vpop.eup %554  ;;  %580 = vpow2.f32 %v299_v32  ;;  %v25_v16 = vsub.f32 %v22_v4, %v23_v5 }
 0x161   :  { %v557_v43 = vpop.eup %556  ;;  %582 = vpow2.f32 %v323_v35  ;;  %v350_v61 = vadd.f32 %v553_v38, %v326_v49  ;;  %v19_v22 = vadd.f32 %v17_v14, %v16_v13  ;;  %v26_v25 = vsub.f32 %v16_v13, %v17_v14 }
 0x162   :  { %v559_v46 = vpop.eup %558  ;;  %584 = vpow2.f32 %v347_v39  ;;  %v38_v26 = vand.u32 2147483647, %v25_v16  ;;  %v40_v27 = vmul.f32 0.5, %v25_v16  ;;  %v29_v31 = vrot.slane %v27_v23, 3 }
 0x163   :  { %v561_v47 = vpop.eup %560  ;;  %v328_v48 = vadd.f32 %v559_v46, %v557_v43  ;;  %586 = vpow2.f32 %v297_v42  ;;  %v660_v8 = vadd.f32 %v555_v40, %v350_v61  ;;  %v32_v32 = vand.u32 2147483647, %v19_v22 }
 0x164   :  { %v563_v51 = vpop.eup %562  ;;  %588 = vpow2.f32 %v321_v44  ;;  %v34_v33 = vmul.f32 0.5, %v19_v22  ;;  %v41_v35 = vmul.f32 %v40_v27, %v25_v16  ;;  %v498_v36 = vadd.f32 -0.5, %v38_v26 }
 0x165   :  { %v565_v53 = vpop.eup %564  ;;  %v352_v56 = vadd.f32 %v561_v47, %v328_v48  ;;  %590 = vpow2.f32 %v371_v52  ;;  %v48_v37 = vand.u32 2147483647, %v26_v25  ;;  %v50_v38 = vmul.f32 0.5, %v26_v25 }
 0x166   :  { %v567_v57 = vpop.eup %566  ;;  %592 = vpow2.f32 %v345_v54  ;;  %vm39_vm2 = vcmp.lt.f32.partialorder %v38_v26, 1.0  ;;  %v31_v41 = vsub.f32 %v16_v13, %v29_v31  ;;  %v35_v42 = vmul.f32 %v34_v33, %v19_v22 }
 0x167   :  { %v569_v59 = vpop.eup %568  ;;  %v657_v60 = vadd.f32 %v563_v51, %v352_v56  ;;  %v325_v62 = vadd.f32 %v567_v57, %v565_v53  ;;  %594 = vpow2.f32 %v369_v1  ;;  %v497_v44 = vadd.f32 -0.5, %v32_v32 }
 0x168   :  { %v571_v63 = vpop.eup %570  ;;  %v43_v45 = vsel %vm39_vm2, %v41_v35, %v498_v36  ;;  %v51_v46 = vmul.f32 %v50_v38, %v26_v25  ;;  %v499_v47 = vadd.f32 -0.5, %v48_v37  ;;  %vm33_vm3 = vcmp.lt.f32.partialorder %v32_v32, 1.0 }
 0x169   :  { %v573_v0 = vpop.eup %572  ;;  %396 = vrot.lane.b32.xlu1 %v657_v60, %s606_s0  ;;  %v349_v9 = vadd.f32 %v569_v59, %v325_v62  ;;  %vm49_vm4 = vcmp.lt.f32.partialorder %v48_v37, 1.0  ;;  %v45_v49 = vrot.slane %v43_v45, 4  ;;  %v37_v50 = vsel %vm33_vm3, %v35_v42, %v497_v44 }
 0x16a   :  { %v575_v3 = vpop.eup %574  ;;  %v53_v51 = vsel %vm49_vm4, %v51_v46, %v499_v47  ;;  %v58_v52 = vand.u32 2147483647, %v31_v41  ;;  %v60_v53 = vmul.f32 0.5, %v31_v41 }
 0x16b   :  { %v577_v6 = vpop.eup %576  ;;  %v327_v7 = vadd.f32 %v575_v3, %v573_v0  ;;  %v373_v18 = vadd.f32 %v571_v63, %v349_v9  ;;  %v47_v54 = vadd.f32 %v45_v49, %v37_v50  ;;  %v55_v55 = vrot.slane %v53_v51, 2 }
 0x16c   :  { %v579_v10 = vpop.eup %578  ;;  %v61_v56 = vmul.f32 %v60_v53, %v31_v41  ;;  %v500_v57 = vadd.f32 -0.5, %v58_v52  ;;  %vm59_vm5 = vcmp.lt.f32.partialorder %v58_v52, 1.0  ;;  %v380_v0 = vsel %vm115_vm0, %v660_v8, 0.0 }
 0x16d   :  { %v581_v11 = vpop.eup %580  ;;  %v351_v12 = vadd.f32 %v577_v6, %v327_v7  ;;  %438 = vrot.lane.b32.xlu1 %v660_v8, %s607_s22  ;;  %v57_v58 = vadd.f32 %v55_v55, %v47_v54  ;;  %v379_v63 = vsel %vm115_vm0, %v373_v18, 0.0 }
 0x16e   :  { %v583_v15 = vpop.eup %582  ;;  %v63_v59 = vsel %vm59_vm5, %v61_v56, %v500_v57  ;;  %v381_v1 = vadd.f32 %v380_v0, %v379_v63 }
 0x16f   :  { %v375_v17 = vadd.f32 %v579_v10, %v351_v12  ;;  %v330_v19 = vadd.f32 %v583_v15, %v581_v11  ;;  %v585_v20 = vpop.eup %584  ;;  %v64_v61 = vadd.f32 %v63_v59, %v57_v58 }
 0x170   :  { %v587_v21 = vpop.eup %586 }
 0x171   :  { %394 = vrot.lane.b32.xlu0 %v375_v17, %s606_s0  ;;  %436 = vrot.lane.b32.xlu1 %v373_v18, %s607_s22  ;;  %v589_v24 = vpop.eup %588  ;;  %v354_v28 = vadd.f32 %v585_v20, %v330_v19  ;;  %v66_v62 = vsel %vm65_vm6, %v64_v61, 0.0 }
 0x172   :  { %v329_v29 = vadd.f32 %v589_v24, %v587_v21  ;;  %v591_v30 = vpop.eup %590 }
 0x173   :  { %v593_v34 = vpop.eup %592  ;;  %v378_v39 = vadd.f32 %v591_v30, %v354_v28 }
 0x174   :  { %v353_v40 = vadd.f32 %v593_v34, %v329_v29  ;;  %v595_v43 = vpop.eup %594 }
 0x175   :  { %455 = vrot.lane.b32.xlu1 %v375_v17, %s607_s22 }
 0x176   :  { %v377_v48 = vadd.f32 %v595_v43, %v353_v40 }
 0x179   :  { %417 = vrot.lane.b32.xlu1 %v378_v39, %s607_s22 }
 0x17d   :  { %415 = vrot.lane.b32.xlu1 %v377_v48, %s607_s22 }
 0x181   :  { %457 = vrot.lane.b32.xlu1 %v657_v60, %s607_s22 }
 0x190   :  { %67 = vadd.xlane.f32.xlu0 %v66_v62 }
 0x1a5   :  { %382 = vadd.xlane.f32.xlu1 %v381_v1 }
 0x1db   :  { %v397_v2 = vpop.permute.xlu1 %396 }
 0x1dc   :  { %v401_v5 = vsel %vm115_vm0, %v397_v2, 0.0 }
 0x1df   :  { %v439_v60 = vpop.permute.xlu1 %438 }
 0x1e0   :  { %v443_v7 = vsel %vm115_vm0, %v439_v60, 0.0 }
 0x1e3   :  { %v395_v3 = vpop.permute.xlu0 %394  ;;  %v437_v4 = vpop.permute.xlu1 %436 }
 0x1e4   :  { %v400_v6 = vsel %vm115_vm0, %v395_v3, 0.0  ;;  %v442_v9 = vsel %vm115_vm0, %v437_v4, 0.0 }
 0x1e5   :  { %v402_v10 = vadd.f32 %v401_v5, %v400_v6  ;;  %v444_v11 = vadd.f32 %v443_v7, %v442_v9 }
 0x1e7   :  { %403 = vadd.xlane.f32.xlu0 %v402_v10  ;;  %v456_v12 = vpop.permute.xlu1 %455  ;;  %445 = vadd.xlane.f32.xlu1 %v444_v11 }
 0x1e8   :  { %v461_v18 = vsel %vm115_vm0, %v456_v12, 0.0 }
 0x1eb   :  { %v418_v8 = vpop.permute.xlu1 %417 }
 0x1ec   :  { %v422_v14 = vsel %vm115_vm0, %v418_v8, 0.0 }
 0x1ef   :  { %v416_v13 = vpop.permute.xlu1 %415 }
 0x1f0   :  { %v421_v15 = vsel %vm115_vm0, %v416_v13, 0.0 }
 0x1f1   :  { %v423_v16 = vadd.f32 %v422_v14, %v421_v15 }
 0x1f3   :  { %v458_v17 = vpop.permute.xlu1 %457  ;;  %424 = vadd.xlane.f32.xlu0 %v423_v16 }
 0x1f4   :  { %v462_v19 = vsel %vm115_vm0, %v458_v17, 0.0 }
 0x1f5   :  { %v463_v20 = vadd.f32 %v462_v19, %v461_v18 }
 0x1f7   :  { %464 = vadd.xlane.f32.xlu0 %v463_v20 }
 0x219   :  { %v68_v21 = vpop.xlane.xlu0 %67 }
 0x21a   :  { %v69_v22 = vrot.slane %v68_v21, 4 }
 0x21c   :  { %v70_v23 = vadd.f32 %v69_v22, %v68_v21 }
 0x21e   :  { %v71_v24 = vrot.slane %v70_v23, 2 }
 0x220   :  { %v72_v25 = vadd.f32 %v71_v24, %v70_v23 }
 0x222   :  { %v73_v26 = vrot.slane %v72_v25, 1 }
 0x224   :  { %v74_v27 = vadd.f32 %v73_v26, %v72_v25 }
 0x226   :  { %532 = vpush %v74_v27 }
 0x22e   :  { %v383_v28 = vpop.xlane.xlu1 %382 }
 0x22f   :  { %v384_v29 = vrot.slane %v383_v28, 4 }
 0x231   :  { %v385_v30 = vadd.f32 %v384_v29, %v383_v28 }
 0x233   :  { %v386_v31 = vrot.slane %v385_v30, 2 }
 0x235   :  { %v387_v32 = vadd.f32 %v386_v31, %v385_v30 }
 0x237   :  { %v388_v33 = vrot.slane %v387_v32, 1 }
 0x239   :  { %v389_v34 = vadd.f32 %v388_v33, %v387_v32 }
 0x23b   :  { %534 = vpush %v389_v34 }
 0x257   :  { %s533_s23 = spop %532 }
 0x258   :  { %s76_s12 = smul.f32 0.0625, %s533_s23 }
 0x26c   :  { %s535_s24 = spop %534 }
 0x26d   :  { %s391_s26 = smul.f32 0.00390625, %s535_s24 }
 0x270   :  { %v404_v35 = vpop.xlane.xlu0 %403  ;;  %v446_v37 = vpop.xlane.xlu1 %445 }
 0x271   :  { %v405_v36 = vrot.slane %v404_v35, 4  ;;  %v447_v39 = vrot.slane %v446_v37, 4 }
 0x273   :  { %v406_v38 = vadd.f32 %v405_v36, %v404_v35  ;;  %v448_v42 = vadd.f32 %v447_v39, %v446_v37 }
 0x275   :  { %v407_v40 = vrot.slane %v406_v38, 2  ;;  %v449_v45 = vrot.slane %v448_v42, 2 }
 0x277   :  { %v408_v41 = vadd.f32 %v407_v40, %v406_v38  ;;  %v450_v49 = vadd.f32 %v449_v45, %v448_v42 }
 0x279   :  { %v409_v43 = vrot.slane %v408_v41, 1  ;;  %v451_v55 = vrot.slane %v450_v49, 1 }
 0x27b   :  { %v410_v44 = vadd.f32 %v409_v43, %v408_v41  ;;  %v452_v61 = vadd.f32 %v451_v55, %v450_v49 }
 0x27c   :  { %v425_v46 = vpop.xlane.xlu0 %424 }
 0x27d   :  { %536 = vpush %v410_v44  ;;  %v426_v47 = vrot.slane %v425_v46, 4 }
 0x27f   :  { %v427_v48 = vadd.f32 %v426_v47, %v425_v46 }
 0x280   :  { %v465_v50 = vpop.xlane.xlu0 %464 }
 0x281   :  { %v428_v51 = vrot.slane %v427_v48, 2  ;;  %v466_v52 = vrot.slane %v465_v50, 4 }
 0x283   :  { %v467_v53 = vadd.f32 %v466_v52, %v465_v50  ;;  %v429_v54 = vadd.f32 %v428_v51, %v427_v48 }
 0x285   :  { %v468_v56 = vrot.slane %v467_v53, 2  ;;  %v430_v57 = vrot.slane %v429_v54, 1 }
 0x287   :  { %v469_v58 = vadd.f32 %v468_v56, %v467_v53  ;;  %v431_v59 = vadd.f32 %v430_v57, %v429_v54 }
 0x289   :  { %538 = vpush %v431_v59  ;;  %v470_v62 = vrot.slane %v469_v58, 1 }
 0x28a   :  { %540 = vpush %v452_v61 }
 0x28b   :  { %v471_v63 = vadd.f32 %v470_v62, %v469_v58 }
 0x28d   :  { %542 = vpush %v471_v63 }
 0x2ae   :  { %s537_s25 = spop %536 }
 0x2af   :  { %s412_s3 = smul.f32 0.00390625, %s537_s25 }
 0x2ba   :  { %s539_s27 = spop %538 }
 0x2bb   :  { %s433_s28 = smul.f32 0.00390625, %s539_s27  ;;  %s541_s29 = spop %540 }
 0x2bc   :  { %s454_s30 = smul.f32 0.00390625, %s541_s29 }
 0x2bd   :  { %s474_s4 = sadd.f32 %s433_s28, %s391_s26 }
 0x2be   :  { %s475_s5 = smul.f32 2.0, %s454_s30  ;;  %s543_s6 = spop %542 }
 0x2bf   :  { %s473_s7 = smul.f32 0.00390625, %s543_s6  ;;  %s477_s8 = sadd.f32 %s433_s28, %s412_s3 }
 0x2c0   :  { %s476_s10 = ssub.f32 %s474_s4, %s475_s5 }
 0x2c1   :  { %s478_s9 = smul.f32 2.0, %s473_s7 }
 0x2c3   :  { %s479_s11 = ssub.f32 %s477_s8, %s478_s9 }
 0x2c5   :  { %s480_s13 = sadd.f32 %s479_s11, %s476_s10 }
 0x2c7   :  { %s481_s14 = sadd.f32 %s480_s13, %s76_s12 }
 0x2c9   :  { %483 = sst [smem:[#allocation2]] %s481_s14 }
 0x2ca   :  { %491 = dma.smem_to_hbm %s608_s15, 16, %s686_s2, [#allocation3]  }
 0x2cb   :  { %604 = dma.done.wait [#allocation3], 16  }
 0x2cc   :  { %605 = vsyncadd [#allocation3], 4294967280 }
 0x2cd   :  { %495 = sfence }
 0x2ce   :  { %496 = vsyncpa [#allocation3], 1 }

</bundles_post_ra>
